<compile_context>
chip_gen: v6e
topology: v6e:2x2x1
jax: 0.10.0
libtpu: 0.0.40
codegen_flags: <defaults>
</compile_context>

<pallas_src>
import jax
import jax.numpy as jnp
from jax.experimental import pallas as pl
from jax.experimental.pallas import tpu as pltpu

DIMS = [28 * 28, 500, 250, 100, 50, 25, 10]
DP_LAYERS = 2
LAYER_DIMS = DIMS[DP_LAYERS:]          # [250, 100, 50, 25, 10]
NUM_CLASSES = LAYER_DIMS[-1]           # 10
LANE = 128


def _round_up(n, m):
    return ((n + m - 1) // m) * m


PAD_IN = [_round_up(d, LANE) for d in LAYER_DIMS[:-1]]   # [256, 128, 128, 128]
W_ROWS = sum(PAD_IN)                                      # 640 rows of packed weights
NUM_LAYERS = len(PAD_IN)                                  # 4


# --------------------------------------------------------------------------- kernel
def _make_kernel(n_valid_rows):
    """Kernel closure; n_valid_rows = true batch size (for row masking / mean)."""
    inv_n = 1.0 / float(n_valid_rows)

    def kernel(x_ref, lab_ref, w_ref, b_ref, logits_ref, loss_ref):
        i = pl.program_id(0)
        b_all = b_ref[...]                                    # (8, 128) f32, rows 0..3 used

        # ---- fused MLP: 4x (Linear + ReLU); bf16 MXU inputs, f32 accumulate ----
        h = x_ref[...]                                        # (TM, 256) f32
        row = 0
        for li, din in enumerate(PAD_IN):
            w = w_ref[row:row + din, :]                       # static slice of bf16 weight pack
            row += din
            acc = jnp.dot(h.astype(jnp.bfloat16), w,
                          preferred_element_type=jnp.float32)
            h = jnp.maximum(acc + b_all[li:li + 1, :], 0.0)   # bias + ReLU in f32
        logits = h                                            # (TM, 128); final ReLU kept (torch parity)
        logits_ref[...] = logits                              # lane-dense, unmasked store

        # ---- cross entropy over the real class lanes, mean over valid rows ----
        tm, cpad = logits.shape
        class_ids = jax.lax.broadcasted_iota(jnp.int32, (tm, cpad), 1)
        class_valid = class_ids < NUM_CLASSES
        masked = jnp.where(class_valid, logits, -1e30)        # padded class lanes excluded
        m = jnp.max(masked, axis=-1, keepdims=True)
        lse = m + jnp.log(jnp.sum(jnp.exp(masked - m), axis=-1, keepdims=True))  # (TM,1)

        labels = lab_ref[...]                                 # (TM, 1) int32
        onehot = jnp.logical_and(class_ids == labels, class_valid).astype(jnp.float32)
        picked = jnp.sum(logits * onehot, axis=-1, keepdims=True)                # (TM,1)

        row_ids = i * tm + jax.lax.broadcasted_iota(jnp.int32, (tm, 1), 0)
        per_row = jnp.where(row_ids < n_valid_rows, lse - picked, 0.0)           # mask pad rows
        tile_sum = jnp.sum(per_row)

        @pl.when(i == 0)
        def _():
            loss_ref[0, 0] = 0.0

        loss_ref[0, 0] += tile_sum

        @pl.when(i == pl.num_programs(0) - 1)
        def _():
            loss_ref[0, 0] = loss_ref[0, 0] * inv_n

    return kernel


# --------------------------------------------------------------------------- wrapper
def _pack_params(params):
    """Zero-pad to lane multiples and pack into one bf16 weight slab + one f32 bias slab."""
    w_blocks, b_rows = [], []
    for (w, b), pin in zip(params, PAD_IN):
        d_in, d_out = w.shape
        wp = jnp.zeros((pin, LANE), jnp.float32).at[:d_in, :d_out].set(w)
        bp = jnp.zeros((LANE,), jnp.float32).at[:d_out].set(b)
        w_blocks.append(wp)
        b_rows.append(bp)
    w_pack = jnp.concatenate(w_blocks, axis=0).astype(jnp.bfloat16)      # (640, 128) bf16
    b_pack = (jnp.zeros((8, LANE), jnp.float32)
              .at[:NUM_LAYERS, :].set(jnp.stack(b_rows, axis=0)))        # (8, 128) f32
    return w_pack, b_pack


def pipe_model_forward(x, labels, params):
    """x: (B, 250) f32, labels: (B,) int.  Returns (logits (B,10) f32, loss () f32)."""
    batch, d_in = x.shape
    assert d_in == LAYER_DIMS[0]

    # Batch tile: multiple of 8 sublanes, capped at 256 rows (fills the 256-row MXU on v6e/v7x;
    # also a fine multiple of 128 for v5e).  Batch is zero-padded to a tile multiple.
    tm = min(256, _round_up(max(batch, 8), 8))
    b_pad = _round_up(batch, tm)
    num_tiles = b_pad // tm

    x_p = jnp.zeros((b_pad, PAD_IN[0]), jnp.float32).at[:batch, :d_in].set(x)
    lab_p = jnp.zeros((b_pad, 1), jnp.int32).at[:batch, 0].set(labels.astype(jnp.int32))
    w_pack, b_pack = _pack_params(params)

    flops = 2 * batch * sum(a * b for a, b in zip(LAYER_DIMS[:-1], LAYER_DIMS[1:]))
    bytes_accessed = int(x_p.size * 4 + lab_p.size * 4 + w_pack.size * 2
                         + b_pack.size * 4 + b_pad * LANE * 4 + 4)
    cost = pl.CostEstimate(flops=int(flops),
                           transcendentals=int(batch * (NUM_CLASSES + 1)),
                           bytes_accessed=bytes_accessed)

    logits_p, loss = pl.pallas_call(
        _make_kernel(batch),
        out_shape=(
            jax.ShapeDtypeStruct((b_pad, LANE), jnp.float32),     # lane-padded logits
            jax.ShapeDtypeStruct((1, 1), jnp.float32),            # scalar loss (SMEM)
        ),
        grid=(num_tiles,),
        in_specs=[
            pl.BlockSpec((tm, PAD_IN[0]), lambda i: (i, 0)),      # x tile
            pl.BlockSpec((tm, 1), lambda i: (i, 0)),              # labels tile
            pl.BlockSpec((W_ROWS, LANE), lambda i: (0, 0)),       # packed weights, VMEM-resident
            pl.BlockSpec((8, LANE), lambda i: (0, 0)),            # packed biases, VMEM-resident
        ],
        out_specs=(
            pl.BlockSpec((tm, LANE), lambda i: (i, 0)),
            pl.BlockSpec(memory_space=pltpu.MemorySpace.SMEM),
        ),
        compiler_params=pltpu.CompilerParams(
            dimension_semantics=("arbitrary",),   # loss accumulates across batch tiles
        ),
        cost_estimate=cost,
    )(x_p, lab_p, w_pack, b_pack)

    return logits_p[:batch, :NUM_CLASSES], loss[0, 0]


def init_params(key):
    """Deterministic init matching the Linear shapes of PipeModel (stored as (in,out))."""
    params = []
    for d_in, d_out in zip(LAYER_DIMS[:-1], LAYER_DIMS[1:]):
        key, kw, kb = jax.random.split(key, 3)
        bound = 1.0 / jnp.sqrt(d_in)
        w = jax.random.uniform(kw, (d_in, d_out), jnp.float32, -bound, bound)
        b = jax.random.uniform(kb, (d_out,), jnp.float32, -bound, bound)
        params.append((w, b))
    return params


def _reference_forward(x, labels, params):
    h = x
    for w, b in params:
        h = jnp.maximum(h @ w + b, 0.0)
    logits = h
    lse = jax.scipy.special.logsumexp(logits, axis=-1)
    picked = jnp.take_along_axis(logits, labels[:, None].astype(jnp.int32), axis=-1)[:, 0]
    return logits, jnp.mean(lse - picked)


if __name__ == "__main__":
    key = jax.random.PRNGKey(0)
    key, kx, kl, kp = jax.random.split(key, 4)

    batch = 8
    x = jax.random.normal(kx, (batch, LAYER_DIMS[0]), jnp.float32)     # (8, 250)
    labels = jax.random.randint(kl, (batch,), 0, NUM_CLASSES, jnp.int32)
    params = init_params(kp)

    logits, loss = pipe_model_forward(x, labels, params)
    jax.block_until_ready((logits, loss))

    assert logits.shape == (batch, NUM_CLASSES)
    assert loss.shape == ()
    assert bool(jnp.isfinite(loss))

    # Pure-JAX reference (f32); kernel uses bf16 MXU inputs, so a loose tolerance.
    ref_logits, ref_loss = _reference_forward(x, labels, params)
    assert jnp.allclose(logits, ref_logits, atol=5e-2, rtol=5e-2)
    assert jnp.allclose(loss, ref_loss, atol=5e-2, rtol=5e-2)

    print("KERNEL_OK")
</pallas_src>

<mosaic_0001>
module attributes {stable_mosaic.version = 11 : i64} {
  func.func @kernel(%arg0: i32, %arg1: memref<8x256xf32, #tpu.memory_space<vmem>>, %arg2: memref<8x1xi32, #tpu.memory_space<vmem>>, %arg3: memref<640x128xbf16, #tpu.memory_space<vmem>>, %arg4: memref<8x128xf32, #tpu.memory_space<vmem>>, %arg5: memref<8x128xf32, #tpu.memory_space<vmem>>, %arg6: memref<1x1xf32, #tpu.memory_space<smem>>) attributes {dimension_semantics = [#tpu.dimension_semantics<arbitrary>], iteration_bounds = array<i64: 1>, scalar_prefetch = 0 : i64, scratch_operands = 0 : i64, tpu.core_type = #tpu.core_type<tc>, window_params = [{transform_indices = @transform_0, window_bounds = array<i64: 8, 256>}, {transform_indices = @transform_1, window_bounds = array<i64: 8, 1>}, {pipeline_mode = #tpu.pipeline_mode<synchronous>, transform_indices = @transform_2, window_bounds = array<i64: 640, 128>}, {pipeline_mode = #tpu.pipeline_mode<synchronous>, transform_indices = @transform_3, window_bounds = array<i64: 8, 128>}, {transform_indices = @transform_4, window_bounds = array<i64: 8, 128>}, {transform_indices = @transform_5, window_bounds = array<i64: 1, 1>}]} {
    %c0 = arith.constant 0 : index
    %c0_0 = arith.constant 0 : index
    %0 = vector.load %arg4[%c0, %c0_0] : memref<8x128xf32, #tpu.memory_space<vmem>>, vector<8x128xf32>
    %c0_1 = arith.constant 0 : index
    %c0_2 = arith.constant 0 : index
    %1 = vector.load %arg1[%c0_1, %c0_2] : memref<8x256xf32, #tpu.memory_space<vmem>>, vector<8x256xf32>
    %c0_3 = arith.constant 0 : index
    %c0_4 = arith.constant 0 : index
    %2 = vector.load %arg3[%c0_3, %c0_4] : memref<640x128xbf16, #tpu.memory_space<vmem>>, vector<256x128xbf16>
    %3 = arith.truncf %1 : vector<8x256xf32> to vector<8x256xbf16>
    %cst = arith.constant dense<0.000000e+00> : vector<8x128xf32>
    %4 = tpu.matmul %3, %2, %cst {dimension_numbers = #tpu.dot_dimension_numbers<[1], [0], [0], [1], [0, 0, 1, 1], [], []>} : vector<8x256xbf16>, vector<256x128xbf16>, vector<8x128xf32> -> vector<8x128xf32>
    %5 = vector.extract_strided_slice %0 {offsets = [0, 0], sizes = [1, 128], strides = [1, 1]} : vector<8x128xf32> to vector<1x128xf32>
    %6 = vector.broadcast %5 : vector<1x128xf32> to vector<8x128xf32>
    %7 = arith.addf %4, %6 : vector<8x128xf32>
    %cst_5 = arith.constant 0.000000e+00 : f32
    %8 = vector.broadcast %cst_5 : f32 to vector<8x128xf32>
    %9 = arith.maximumf %7, %8 : vector<8x128xf32>
    %c256 = arith.constant 256 : index
    %c0_6 = arith.constant 0 : index
    %10 = vector.load %arg3[%c256, %c0_6] : memref<640x128xbf16, #tpu.memory_space<vmem>>, vector<128x128xbf16>
    %11 = arith.truncf %9 : vector<8x128xf32> to vector<8x128xbf16>
    %cst_7 = arith.constant dense<0.000000e+00> : vector<8x128xf32>
    %12 = tpu.matmul %11, %10, %cst_7 {dimension_numbers = #tpu.dot_dimension_numbers<[1], [0], [0], [1], [0, 0, 1, 1], [], []>} : vector<8x128xbf16>, vector<128x128xbf16>, vector<8x128xf32> -> vector<8x128xf32>
    %13 = vector.extract_strided_slice %0 {offsets = [1, 0], sizes = [1, 128], strides = [1, 1]} : vector<8x128xf32> to vector<1x128xf32>
    %14 = vector.broadcast %13 : vector<1x128xf32> to vector<8x128xf32>
    %15 = arith.addf %12, %14 : vector<8x128xf32>
    %cst_8 = arith.constant 0.000000e+00 : f32
    %16 = vector.broadcast %cst_8 : f32 to vector<8x128xf32>
    %17 = arith.maximumf %15, %16 : vector<8x128xf32>
    %c384 = arith.constant 384 : index
    %c0_9 = arith.constant 0 : index
    %18 = vector.load %arg3[%c384, %c0_9] : memref<640x128xbf16, #tpu.memory_space<vmem>>, vector<128x128xbf16>
    %19 = arith.truncf %17 : vector<8x128xf32> to vector<8x128xbf16>
    %cst_10 = arith.constant dense<0.000000e+00> : vector<8x128xf32>
    %20 = tpu.matmul %19, %18, %cst_10 {dimension_numbers = #tpu.dot_dimension_numbers<[1], [0], [0], [1], [0, 0, 1, 1], [], []>} : vector<8x128xbf16>, vector<128x128xbf16>, vector<8x128xf32> -> vector<8x128xf32>
    %21 = vector.extract_strided_slice %0 {offsets = [2, 0], sizes = [1, 128], strides = [1, 1]} : vector<8x128xf32> to vector<1x128xf32>
    %22 = vector.broadcast %21 : vector<1x128xf32> to vector<8x128xf32>
    %23 = arith.addf %20, %22 : vector<8x128xf32>
    %cst_11 = arith.constant 0.000000e+00 : f32
    %24 = vector.broadcast %cst_11 : f32 to vector<8x128xf32>
    %25 = arith.maximumf %23, %24 : vector<8x128xf32>
    %c512 = arith.constant 512 : index
    %c0_12 = arith.constant 0 : index
    %26 = vector.load %arg3[%c512, %c0_12] : memref<640x128xbf16, #tpu.memory_space<vmem>>, vector<128x128xbf16>
    %27 = arith.truncf %25 : vector<8x128xf32> to vector<8x128xbf16>
    %cst_13 = arith.constant dense<0.000000e+00> : vector<8x128xf32>
    %28 = tpu.matmul %27, %26, %cst_13 {dimension_numbers = #tpu.dot_dimension_numbers<[1], [0], [0], [1], [0, 0, 1, 1], [], []>} : vector<8x128xbf16>, vector<128x128xbf16>, vector<8x128xf32> -> vector<8x128xf32>
    %29 = vector.extract_strided_slice %0 {offsets = [3, 0], sizes = [1, 128], strides = [1, 1]} : vector<8x128xf32> to vector<1x128xf32>
    %30 = vector.broadcast %29 : vector<1x128xf32> to vector<8x128xf32>
    %31 = arith.addf %28, %30 : vector<8x128xf32>
    %cst_14 = arith.constant 0.000000e+00 : f32
    %32 = vector.broadcast %cst_14 : f32 to vector<8x128xf32>
    %33 = arith.maximumf %31, %32 : vector<8x128xf32>
    %c0_15 = arith.constant 0 : index
    %c0_16 = arith.constant 0 : index
    %34 = vector.load %arg5[%c0_15, %c0_16] : memref<8x128xf32, #tpu.memory_space<vmem>>, vector<8x128xf32>
    tpu.vector_store %arg5[%c0_15, %c0_16], %33 {strides = array<i32>} : memref<8x128xf32, #tpu.memory_space<vmem>>, vector<8x128xf32>,
    %35 = tpu.iota {dimensions = array<i32: 1>} : vector<8x128xi32>
    %c10_i32 = arith.constant 10 : i32
    %36 = vector.broadcast %c10_i32 : i32 to vector<8x128xi32>
    %37 = arith.cmpi slt, %35, %36 : vector<8x128xi32>
    %cst_17 = arith.constant -1.000000e+30 : f32
    %38 = vector.broadcast %cst_17 : f32 to vector<8x128xf32>
    %39 = arith.select %37, %33, %38 : vector<8x128xi1>, vector<8x128xf32>
    %cst_18 = arith.constant dense<0xFF800000> : vector<8xf32>
    %40 = vector.multi_reduction <maximumf>, %39, %cst_18 [1] : vector<8x128xf32> to vector<8xf32>
    %41 = vector.shape_cast %40 : vector<8xf32> to vector<8x1xf32>
    %42 = vector.broadcast %41 : vector<8x1xf32> to vector<8x128xf32>
    %43 = arith.subf %39, %42 : vector<8x128xf32>
    %44 = math.exp %43 : vector<8x128xf32>
    %cst_19 = arith.constant dense<0.000000e+00> : vector<8xf32>
    %45 = vector.multi_reduction <add>, %44, %cst_19 [1] : vector<8x128xf32> to vector<8xf32>
    %46 = vector.shape_cast %45 : vector<8xf32> to vector<8x1xf32>
    %47 = math.log %46 : vector<8x1xf32>
    %48 = arith.addf %41, %47 : vector<8x1xf32>
    %c0_20 = arith.constant 0 : index
    %c0_21 = arith.constant 0 : index
    %49 = vector.load %arg2[%c0_20, %c0_21] : memref<8x1xi32, #tpu.memory_space<vmem>>, vector<8x1xi32>
    %50 = vector.broadcast %49 : vector<8x1xi32> to vector<8x128xi32>
    %51 = arith.cmpi eq, %35, %50 : vector<8x128xi32>
    %52 = arith.andi %51, %37 : vector<8x128xi1>
    %53 = arith.extui %52 : vector<8x128xi1> to vector<8x128xi32>
    %54 = arith.sitofp %53 : vector<8x128xi32> to vector<8x128xf32>
    %55 = arith.mulf %33, %54 : vector<8x128xf32>
    %cst_22 = arith.constant dense<0.000000e+00> : vector<8xf32>
    %56 = vector.multi_reduction <add>, %55, %cst_22 [1] : vector<8x128xf32> to vector<8xf32>
    %57 = vector.shape_cast %56 : vector<8xf32> to vector<8x1xf32>
    %c8_i32 = arith.constant 8 : i32
    %58 = arith.muli %arg0, %c8_i32 : i32
    %59 = tpu.iota {dimensions = array<i32: 0>} : vector<8x1xi32>
    %60 = vector.broadcast %58 : i32 to vector<8x1xi32>
    %61 = arith.addi %60, %59 : vector<8x1xi32>
    %c8_i32_23 = arith.constant 8 : i32
    %62 = vector.broadcast %c8_i32_23 : i32 to vector<8x1xi32>
    %63 = arith.cmpi slt, %61, %62 : vector<8x1xi32>
    %64 = arith.subf %48, %57 : vector<8x1xf32>
    %cst_24 = arith.constant 0.000000e+00 : f32
    %65 = vector.broadcast %cst_24 : f32 to vector<8x1xf32>
    %66 = arith.select %63, %64, %65 : vector<8x1xi1>, vector<8x1xf32>
    %67 = vector.shape_cast %66 : vector<8x1xf32> to vector<1x8x1xf32>
    %cst_25 = arith.constant dense<0.000000e+00> : vector<1xf32>
    %68 = vector.multi_reduction <add>, %67, %cst_25 [1, 2] : vector<1x8x1xf32> to vector<1xf32>
    %69 = vector.shape_cast %68 : vector<1xf32> to vector<1x1x1xf32>
    %70 = vector.extract %69[0, 0, 0] : f32 from vector<1x1x1xf32>
    %c0_i32 = arith.constant 0 : i32
    %71 = arith.cmpi eq, %arg0, %c0_i32 : i32
    %72 = arith.extui %71 : i1 to i32
    %c0_i32_26 = arith.constant 0 : i32
    %73 = arith.cmpi ne, %72, %c0_i32_26 : i32
    scf.if %73 {
      %cst_33 = arith.constant 0.000000e+00 : f32
      %c0_34 = arith.constant 0 : index
      %c0_35 = arith.constant 0 : index
      %80 = memref.load %arg6[%c0_34, %c0_35] : memref<1x1xf32, #tpu.memory_space<smem>>
      memref.store %cst_33, %arg6[%c0_34, %c0_35] : memref<1x1xf32, #tpu.memory_space<smem>>
    } else {
    }
    %c0_27 = arith.constant 0 : index
    %c0_28 = arith.constant 0 : index
    %74 = memref.load %arg6[%c0_27, %c0_28] : memref<1x1xf32, #tpu.memory_space<smem>>
    %75 = arith.addf %74, %70 : f32
    %c0_29 = arith.constant 0 : index
    %c0_30 = arith.constant 0 : index
    %76 = memref.load %arg6[%c0_29, %c0_30] : memref<1x1xf32, #tpu.memory_space<smem>>
    memref.store %75, %arg6[%c0_29, %c0_30] : memref<1x1xf32, #tpu.memory_space<smem>>
    %c0_i32_31 = arith.constant 0 : i32
    %77 = arith.cmpi eq, %arg0, %c0_i32_31 : i32
    %78 = arith.extui %77 : i1 to i32
    %c0_i32_32 = arith.constant 0 : i32
    %79 = arith.cmpi ne, %78, %c0_i32_32 : i32
    scf.if %79 {
      %c0_33 = arith.constant 0 : index
      %c0_34 = arith.constant 0 : index
      %80 = memref.load %arg6[%c0_33, %c0_34] : memref<1x1xf32, #tpu.memory_space<smem>>
      %cst_35 = arith.constant 1.250000e-01 : f32
      %81 = arith.mulf %80, %cst_35 : f32
      %c0_36 = arith.constant 0 : index
      %c0_37 = arith.constant 0 : index
      %82 = memref.load %arg6[%c0_36, %c0_37] : memref<1x1xf32, #tpu.memory_space<smem>>
      memref.store %81, %arg6[%c0_36, %c0_37] : memref<1x1xf32, #tpu.memory_space<smem>>
    } else {
    }
    return
  }
  func.func @transform_0(%arg0: i32) -> (i32, i32) {
    %c0_i32 = arith.constant 0 : i32
    %c0_i32_0 = arith.constant 0 : i32
    return %arg0, %c0_i32 : i32, i32
  }
  func.func @transform_1(%arg0: i32) -> (i32, i32) {
    %c0_i32 = arith.constant 0 : i32
    %c0_i32_0 = arith.constant 0 : i32
    return %arg0, %c0_i32 : i32, i32
  }
  func.func @transform_2(%arg0: i32) -> (i32, i32) {
    %c0_i32 = arith.constant 0 : i32
    %c0_i32_0 = arith.constant 0 : i32
    %c0_i32_1 = arith.constant 0 : i32
    return %c0_i32, %c0_i32_0 : i32, i32
  }
  func.func @transform_3(%arg0: i32) -> (i32, i32) {
    %c0_i32 = arith.constant 0 : i32
    %c0_i32_0 = arith.constant 0 : i32
    %c0_i32_1 = arith.constant 0 : i32
    return %c0_i32, %c0_i32_0 : i32, i32
  }
  func.func @transform_4(%arg0: i32) -> (i32, i32) {
    %c0_i32 = arith.constant 0 : i32
    %c0_i32_0 = arith.constant 0 : i32
    return %arg0, %c0_i32 : i32, i32
  }
  func.func @transform_5(%arg0: i32) -> (i32, i32) {
    %c0_i32 = arith.constant 0 : i32
    %c0_i32_0 = arith.constant 0 : i32
    %c0_i32_1 = arith.constant 0 : i32
    return %c0_i32, %c0_i32_0 : i32, i32
  }
}

</mosaic_0001>

<bundles_post_ra>
// kernel: tpu_custom_call.1
= control target key start
LH: loop header
LB: loop body
LE: loop exit
PB: predicated region body
PF: predicated region fallthrough
CT: control target
= control target key end

     0   :  { %11 = vsyncpa [#allocation3], 0  ;;  %s1033_s0 = inlined_call_operand.hbm [shape: f32[8,256], index: 0, kind: input, shape index: {}]   ;;  %s1034_s1 = inlined_call_operand.vmem [shape: s32[8,1], index: 1, kind: input, shape index: {}]   ;;  %s1035_s2 = inlined_call_operand.hbm [shape: bf16[640,128], index: 2, kind: input, shape index: {}]   ;;  %s1036_s3 = inlined_call_operand.vmem [shape: f32[8,128], index: 3, kind: input, shape index: {}]   ;;  %s1037_s4 = inlined_call_operand.hbm [shape: f32[8,128], index: 4, kind: output, shape index: {0}]   ;;  %s1038_s5 = inlined_call_operand.hbm [shape: f32[1,1], index: 5, kind: output, shape index: {1}]  }
   0x1   :  { %12 = vsyncpa [#allocation7], 0 }
   0x2   :  { %13 = vsyncpa [#allocation4], 0 }
   0x3   :  { %14 = vsyncpa [#allocation5], 0  ;;  %s929_s18 = smov [#allocation2]   ;;  %s930_s20 = smov [#allocation6]  }
   0x4   :  { %s21_s19 = sshll.u32 %s929_s18, 4  ;;  %s32_s21 = sshll.u32 %s930_s20, 4  ;;  %s22_s19 = int_to_ptr.vmem [resolvable:$true] %s21_s19  ;;  %s33_s21 = int_to_ptr.vmem [resolvable:$true] %s32_s21 }
   0x5   :  { %s861_s22 = scalar_lea.vmem %s22_s19, 256  ;;  %p866_p1 = scmp.lt.s32.totalorder %s22_s19, %s22_s19 }
   0x6   :  { %p862_p0 = scmp.ne.s32.totalorder %s22_s19, %s861_s22  ;;  %p867_p2 = scmp.lt.s32.totalorder %s861_s22, %s861_s22 }
   0x8   :  { %p868_p3 = por %p867_p2, %p866_p1 }
   0xa   :  { %p869_p4 = pnand %p868_p3, %p862_p0 }
   0xc   :  { %872 = shalt.err (!%p869_p4)
}
   0xd   :  { %24 = dma.hbm_to_vmem [thread:$0]  %s1033_s0, 256, %s22_s19, [#allocation3]  }
   0xe   :  { %s881_s25 = scalar_lea.vmem %s33_s21, 5120  ;;  %p886_p6 = scmp.lt.s32.totalorder %s33_s21, %s33_s21 }
   0xf   :  { %p882_p5 = scmp.ne.s32.totalorder %s33_s21, %s881_s25  ;;  %p887_p7 = scmp.lt.s32.totalorder %s881_s25, %s881_s25 }
  0x11   :  { %p888_p8 = por %p887_p7, %p886_p6 }
  0x13   :  { %p889_p9 = pnand %p888_p8, %p882_p5 }
  0x15   :  { %892 = shalt.err (!%p889_p9)
}
  0x16   :  { %s931_s26 = smov 64   ;;  %s932_s27 = smov 4  }
  0x17   :  { %38 = dma.hbm_to_vmem [thread:$0]  %s1035_s2, 5120, %s33_s21, [#allocation7], %s931_s26, %s931_s26, %s932_s27  }
  0x18   :  { %921 = dma.done.wait [#allocation3], 256  }
  0x19   :  { %922 = vsyncadd [#allocation3], 4294967040 }
  0x1a   :  { %923 = dma.done.wait [#allocation7], 5120  }
  0x1b   :  { %924 = vsyncadd [#allocation7], 4294962176  ;;  %v933_v0 = vmov 0.0   ;;  %v809_v1 = vld [vmem:[#allocation6 + $0x78] sm:$0xff]   ;;  %v811_v3 = vld [vmem:[#allocation6 + $0x70] sm:$0xff]   ;;  %vm934_vm0 = vmmov 0   ;;  %v85_v35 = vlaneseq }
  0x1c   :  { %736 = vmatprep.subr.bf16.mxu1 %v933_v0  ;;  %v810_v2 = vld [vmem:[#allocation6 + $0x38] sm:$0xff]   ;;  %687 = vmatprep.subr.bf16.mxu0 %v809_v1  ;;  %v812_v4 = vld [vmem:[#allocation6 + $0x30] sm:$0xff]   ;;  %v813_v5 = vld [vmem:[#allocation6 + $0x68] sm:$0xff]   ;;  %vm590_vm4 = vcmask 7168  }
  0x1d   :  { %688 = vmatpush3.bf16.msra.mxu0 %v810_v2  ;;  %v814_v6 = vld [vmem:[#allocation6 + $0x28] sm:$0xff]   ;;  %v815_v7 = vld [vmem:[#allocation6 + $0x60] sm:$0xff]   ;;  %v817_v9 = vld [vmem:[#allocation6 + $0x58] sm:$0xff]   ;;  %752 = vmatprep.mubr.msk.bf16.mxu1 %vm934_vm0, %v933_v0  ;;  %v995_v36 = vshrl.u32 %v85_v35, 7 }
  0x1e   :  { %689 = vmatprep.subr.bf16.mxu0 %v811_v3  ;;  %v816_v8 = vld [vmem:[#allocation6 + $0x20] sm:$0xff]   ;;  %v818_v10 = vld [vmem:[#allocation6 + $0x18] sm:$0xff]   ;;  %v819_v11 = vld [vmem:[#allocation6 + $0x50] sm:$0xff]  }
  0x1f   :  { %v50_v12 = vld [vmem:[#allocation2 + $0x8] sm:$0xff]  ;;  %v820_v15 = vld [vmem:[#allocation6 + $0x10] sm:$0xff]   ;;  %v821_v16 = vld [vmem:[#allocation6 + $0x48] sm:$0xff]   ;;  %v87_v37 = vsub.s32 0, %v995_v36  ;;  %v245_v56 = vsub.s32 1, %v995_v36 }
  0x20   :  { %v84_v13 = vpack.c.bf16 %v50_v12, %v50_v12  ;;  %v825_v14 = vld [vmem:[#allocation6 + $0xb8] sm:$0xff]   ;;  %v826_v17 = vld [vmem:[#allocation6 + $0xb0] sm:$0xff]   ;;  %v822_v18 = vld [vmem:[#allocation6 + $0x8] sm:$0xff]  }
  0x21   :  { %690 = vmatpush3.bf16.msra.mxu0 %v812_v4  ;;  %737 = vmatpush3.bf16.msra.mxu1 %v825_v14  ;;  %v823_v19 = vld [vmem:[#allocation6 + $0x40] sm:$0xff]   ;;  %v827_v20 = vld [vmem:[#allocation6 + $0xa8] sm:$0xff]   ;;  %v49_v22 = vld [vmem:[#allocation2] sm:$0xff]  ;;  %v355_v4 = vsub.s32 2, %v995_v36  ;;  %v465_v14 = vsub.s32 3, %v995_v36 }
  0x22   :  { %691 = vmatprep.subr.bf16.mxu0 %v813_v5  ;;  %217 = vmatprep.mubr.bf16.mxu0 %v84_v13  ;;  %v824_v21 = vld [vmem:[#allocation6] sm:$0xff]   ;;  %v83_v24 = vpack.c.bf16 %v49_v22, %v49_v22  ;;  %v829_v25 = vld [vmem:[#allocation6 + $0x98] sm:$0xff]   ;;  %v830_v26 = vld [vmem:[#allocation6 + $0x90] sm:$0xff]   ;;  %v935_v13 = vmov 0  }
  0x23   :  { %738 = vmatprep.subr.bf16.mxu1 %v933_v0  ;;  %v828_v23 = vld [vmem:[#allocation6 + $0xa0] sm:$0xff]   ;;  %v831_v27 = vld [vmem:[#allocation6 + $0x88] sm:$0xff]   ;;  %v833_v29 = vld [vmem:[#allocation6 + $0xf8] sm:$0xff]   ;;  %808 = vset.pattern.permute.xlu0 %v935_v13 }
  0x24   :  { %v832_v28 = vld [vmem:[#allocation6 + $0x80] sm:$0xff]   ;;  %v834_v30 = vld [vmem:[#allocation6 + $0xf0] sm:$0xff]   ;;  %v835_v31 = vld [vmem:[#allocation6 + $0xe8] sm:$0xff]  }
  0x25   :  { %692 = vmatpush3.bf16.msra.mxu0 %v814_v6  ;;  %739 = vmatpush3.bf16.msra.mxu1 %v826_v17  ;;  %v836_v32 = vld [vmem:[#allocation6 + $0xe0] sm:$0xff]   ;;  %v837_v33 = vld [vmem:[#allocation6 + $0xd8] sm:$0xff]   ;;  %v838_v34 = vld [vmem:[#allocation6 + $0xd0] sm:$0xff]  }
  0x26   :  { %693 = vmatprep.subr.bf16.mxu0 %v815_v7  ;;  %740 = vmatprep.subr.bf16.mxu1 %v933_v0  ;;  %v1001_v38 = vld [vmem:[%s1036_s3] sm:$0xff]  ;;  %v839_v48 = vld [vmem:[#allocation6 + $0xc8] sm:$0xff]   ;;  %v840_v49 = vld [vmem:[#allocation6 + $0xc0] sm:$0xff]  }
  0x27   :  { %v88_v40 = vrot.slane %v1001_v38, %v87_v37  ;;  %v841_v50 = vld [vmem:[#allocation6 + $0x138] sm:$0xff]   ;;  %v842_v51 = vld [vmem:[#allocation6 + $0x130] sm:$0xff]   ;;  %v843_v52 = vld [vmem:[#allocation6 + $0x128] sm:$0xff]   ;;  %v246_v57 = vrot.slane %v1001_v38, %v245_v56  ;;  %v356_v5 = vrot.slane %v1001_v38, %v355_v4 }
  0x28   :  { %v844_v53 = vld [vmem:[#allocation6 + $0x120] sm:$0xff]   ;;  %v845_v54 = vld [vmem:[#allocation6 + $0x118] sm:$0xff]   ;;  %v846_v55 = vld [vmem:[#allocation6 + $0x110] sm:$0xff]  }
  0x29   :  { %694 = vmatpush3.bf16.msra.mxu0 %v816_v8  ;;  %741 = vmatpush3.bf16.msra.mxu1 %v827_v20  ;;  %v847_v2 = vld [vmem:[#allocation6 + $0x108] sm:$0xff]   ;;  %v848_v3 = vld [vmem:[#allocation6 + $0x100] sm:$0xff]  }
  0x2a   :  { %695 = vmatprep.subr.bf16.mxu0 %v817_v9  ;;  %742 = vmatprep.subr.bf16.mxu1 %v933_v0 }
  0x2d   :  { %696 = vmatpush3.bf16.msra.mxu0 %v818_v10  ;;  %743 = vmatpush3.bf16.msra.mxu1 %v828_v23 }
  0x2e   :  { %697 = vmatprep.subr.bf16.mxu0 %v819_v11  ;;  %744 = vmatprep.subr.bf16.mxu1 %v933_v0 }
  0x31   :  { %698 = vmatpush3.bf16.msra.mxu0 %v820_v15  ;;  %745 = vmatpush3.bf16.msra.mxu1 %v829_v25  ;;  %v466_v15 = vrot.slane %v1001_v38, %v465_v14 }
  0x32   :  { %699 = vmatprep.subr.bf16.mxu0 %v821_v16  ;;  %746 = vmatprep.subr.bf16.mxu1 %v933_v0  ;;  %v558_v16 = vand.u32 127, %v85_v35 }
  0x34   :  { %vm559_vm1 = vcmp.lt.s32.totalorder %v558_v16, 10 }
  0x35   :  { %700 = vmatpush3.bf16.msra.mxu0 %v822_v18  ;;  %747 = vmatpush3.bf16.msra.mxu1 %v830_v26 }
  0x36   :  { %701 = vmatprep.subr.bf16.mxu0 %v823_v19  ;;  %748 = vmatprep.subr.bf16.mxu1 %v933_v0 }
  0x39   :  { %702 = vmatpush3.bf16.msra.mxu0 %v824_v21  ;;  %749 = vmatpush3.bf16.msra.mxu1 %v831_v27 }
  0x3a   :  { %756 = vmatprep.subr.bf16.mxu0 %v933_v0  ;;  %750 = vmatprep.subr.bf16.mxu1 %v933_v0 }
  0x3c   :  { %218 = vmatmul.mubr.bf16.vlgmr.msra.gmra.mxu0 %v83_v24  ;;  %v571_v24 = vld [vmem:[%s1034_s1] sm:$0xff]  ;;  %s936_s1 = smov [#allocation8]  }
  0x3d   :  { %751 = vmatpush3.bf16.msra.mxu1 %v832_v28  ;;  %772 = vmatprep.mubr.msk.bf16.mxu0 %vm934_vm0, %v933_v0  ;;  %s623_s6 = sshll.u32 %s936_s1, 4  ;;  %s624_s6 = int_to_ptr.vmem [resolvable:$true] %s623_s6 }
  0x3e   :  { %776 = vmatprep.subr.bf16.mxu1 %v933_v0  ;;  %757 = vmatpush3.bf16.msra.mxu0 %v833_v29  ;;  %s893_s7 = scalar_lea.vmem %s624_s6, 128  ;;  %p898_p11 = scmp.lt.s32.totalorder %s624_s6, %s624_s6 }
  0x3f   :  { %758 = vmatprep.subr.bf16.mxu0 %v933_v0  ;;  %p894_p10 = scmp.ne.s32.totalorder %s624_s6, %s893_s7  ;;  %p899_p12 = scmp.lt.s32.totalorder %s893_s7, %s893_s7 }
  0x41   :  { %p900_p13 = por %p899_p12, %p898_p11 }
  0x42   :  { %759 = vmatpush3.bf16.msra.mxu0 %v834_v30 }
  0x43   :  { %760 = vmatprep.subr.bf16.mxu0 %v933_v0  ;;  %p901_p0 = pnand %p900_p13, %p894_p10 }
  0x46   :  { %761 = vmatpush3.bf16.msra.mxu0 %v835_v31 }
  0x47   :  { %762 = vmatprep.subr.bf16.mxu0 %v933_v0 }
  0x4a   :  { %763 = vmatpush3.bf16.msra.mxu0 %v836_v32 }
  0x4b   :  { %764 = vmatprep.subr.bf16.mxu0 %v933_v0 }
  0x4e   :  { %765 = vmatpush3.bf16.msra.mxu0 %v837_v33 }
  0x4f   :  { %766 = vmatprep.subr.bf16.mxu0 %v933_v0 }
  0x52   :  { %767 = vmatpush3.bf16.msra.mxu0 %v838_v34 }
  0x53   :  { %768 = vmatprep.subr.bf16.mxu0 %v933_v0 }
  0x56   :  { %769 = vmatpush3.bf16.msra.mxu0 %v839_v48 }
  0x57   :  { %770 = vmatprep.subr.bf16.mxu0 %v933_v0 }
  0x5a   :  { %771 = vmatpush3.bf16.msra.mxu0 %v840_v49 }
  0xfc   :  { %v703_v39 = vpop.f32.mrf.mxu0 }
  0xfe   :  { %v704_v41 = vpop.f32.mrf.mxu0 }
  0xff   :  { %v705_v42 = vadd.f32 %v704_v41, %v703_v39 }
 0x100   :  { %v706_v43 = vpop.f32.mrf.mxu0 }
 0x101   :  { %v220_v44 = vadd.f32 %v705_v42, %v88_v40 }
 0x102   :  { %v707_v45 = vpop.f32.mrf.mxu0 }
 0x103   :  { %v225_v46 = vmax.f32 %v220_v44, 0.0 }
 0x105   :  { %v242_v47 = vpack.c.bf16 %v225_v46, %v225_v46 }
 0x107   :  { %753 = vmatmul.mubr.bf16.vlgmr.msra.gmra.mxu1 %v242_v47 }
 0x108   :  { %792 = vmatprep.mubr.msk.bf16.mxu1 %vm934_vm0, %v933_v0  ;;  %777 = vmatpush3.bf16.msra.mxu1 %v841_v50 }
 0x109   :  { %778 = vmatprep.subr.bf16.mxu1 %v933_v0 }
 0x10c   :  { %779 = vmatpush3.bf16.msra.mxu1 %v842_v51 }
 0x10d   :  { %780 = vmatprep.subr.bf16.mxu1 %v933_v0 }
 0x110   :  { %781 = vmatpush3.bf16.msra.mxu1 %v843_v52 }
 0x111   :  { %782 = vmatprep.subr.bf16.mxu1 %v933_v0 }
 0x114   :  { %783 = vmatpush3.bf16.msra.mxu1 %v844_v53 }
 0x115   :  { %784 = vmatprep.subr.bf16.mxu1 %v933_v0 }
 0x118   :  { %785 = vmatpush3.bf16.msra.mxu1 %v845_v54 }
 0x119   :  { %786 = vmatprep.subr.bf16.mxu1 %v933_v0 }
 0x11c   :  { %787 = vmatpush3.bf16.msra.mxu1 %v846_v55 }
 0x11d   :  { %788 = vmatprep.subr.bf16.mxu1 %v933_v0 }
 0x120   :  { %789 = vmatpush3.bf16.msra.mxu1 %v847_v2 }
 0x121   :  { %790 = vmatprep.subr.bf16.mxu1 %v933_v0 }
 0x124   :  { %791 = vmatpush3.bf16.msra.mxu1 %v848_v3 }
 0x1c7   :  { %v329_v58 = vpop.f32.mrf.mxu1 }
 0x1c8   :  { %v330_v59 = vadd.f32 %v329_v58, %v246_v57 }
 0x1c9   :  { %v754_v60 = vpop.f32.mrf.mxu1 }
 0x1ca   :  { %v335_v61 = vmax.f32 %v330_v59, 0.0 }
 0x1cb   :  { %v332_v62 = vpop.f32.mrf.mxu1 }
 0x1cc   :  { %v352_v63 = vpack.c.bf16 %v335_v61, %v335_v61 }
 0x1cd   :  { %v755_v1 = vpop.f32.mrf.mxu1 }
 0x1ce   :  { %773 = vmatmul.mubr.bf16.vlgmr.msra.gmra.mxu0 %v352_v63 }
 0x28e   :  { %v439_v6 = vpop.f32.mrf.mxu0 }
 0x28f   :  { %v440_v7 = vadd.f32 %v439_v6, %v356_v5 }
 0x290   :  { %v774_v8 = vpop.f32.mrf.mxu0 }
 0x291   :  { %v445_v9 = vmax.f32 %v440_v7, 0.0 }
 0x292   :  { %v442_v10 = vpop.f32.mrf.mxu0 }
 0x293   :  { %v462_v11 = vpack.c.bf16 %v445_v9, %v445_v9 }
 0x294   :  { %v775_v12 = vpop.f32.mrf.mxu0 }
 0x295   :  { %793 = vmatmul.mubr.bf16.vlgmr.msra.gmra.mxu1 %v462_v11 }
 0x355   :  { %v549_v17 = vpop.f32.mrf.mxu1 }
 0x356   :  { %v550_v18 = vadd.f32 %v549_v17, %v466_v15 }
 0x357   :  { %v794_v19 = vpop.f32.mrf.mxu1 }
 0x358   :  { %v555_v20 = vmax.f32 %v550_v18, 0.0 }
 0x359   :  { %v552_v21 = vpop.f32.mrf.mxu1 }
 0x35a   :  { %556 = vst [vmem:[#allocation8] sm:$0xff] %v555_v20  ;;  %v560_v22 = vsel %vm559_vm1, %v555_v20, -1e+30 }
 0x35b   :  { %561 = vmax.xlane.f32.xlu0 %v560_v22  ;;  %v795_v23 = vpop.f32.mrf.mxu1 }
 0x371   :  { %573 = vperm.xlu0 %808, %v571_v24  }
 0x3e4   :  { %v562_v25 = vpop.xlane.xlu0 %561 }
 0x3e5   :  { %v563_v26 = vsub.f32 %v560_v22, %v562_v25 }
 0x3e7   :  { %v564_v27 = vmul.f32 1.442695, %v563_v26 }
 0x3e9   :  { %849 = vpow2.f32 %v564_v27 }
 0x3ec   :  { %v574_v28 = vpop.permute.xlu0 %573 }
 0x3ed   :  { %vm575_vm2 = vcmp.eq.s32.totalorder %v558_v16, %v574_v28 }
 0x3ee   :  { %vm576_vm3 = vmand %vm575_vm2, %vm559_vm1 }
 0x3ef   :  { %v686_v30 = vsel %vm576_vm3, 1.0, %v933_v0 }
 0x3f0   :  { %v579_v31 = vmul.f32 %v686_v30, %v555_v20 }
 0x3f6   :  { %v850_v29 = vpop.eup %849 }
 0x3f7   :  { %566 = vadd.xlane.f32.xlu1 %v850_v29 }
 0x3fb   :  { %580 = vadd.xlane.f32.xlu1 %v579_v31 }
 0x480   :  { %v567_v32 = vpop.xlane.xlu1 %566 }
 0x481   :  { %851 = vlog2.f32 %v567_v32 }
 0x484   :  { %v581_v36 = vpop.xlane.xlu1 %580 }
 0x48e   :  { %v852_v33 = vpop.eup %851 }
 0x48f   :  { %v569_v34 = vmul.f32 0.6931472, %v852_v33 }
 0x491   :  { %v570_v35 = vadd.f32 %v569_v34, %v562_v25 }
 0x493   :  { %v588_v37 = vsub.f32 %v570_v35, %v581_v36 }
 0x495   :  { %v591_v38 = vsel %vm590_vm4, %v588_v37, 0.0 }
 0x496   :  { %592 = vadd.xlane.f32.xlu1 %v591_v38 }
 0x497   :  { %904 = shalt.err (!%p901_p0)
}
 0x498   :  { %626 = dma.vmem_to_hbm [thread:$0]  %s624_s6, 128, %s1037_s4, [#allocation4]  }
 0x499   :  { %s937_s12 = smov [#allocation9]  }
 0x51f   :  { %v593_v0 = vpop.xlane.xlu1 %592 }
 0x520   :  { %v594_v39 = vrot.slane %v593_v0, 4 }
 0x522   :  { %v595_v40 = vadd.f32 %v594_v39, %v593_v0 }
 0x524   :  { %v596_v41 = vrot.slane %v595_v40, 2 }
 0x526   :  { %v597_v42 = vadd.f32 %v596_v41, %v595_v40 }
 0x528   :  { %v598_v43 = vrot.slane %v597_v42, 1 }
 0x52a   :  { %v599_v44 = vadd.f32 %v598_v43, %v597_v42 }
 0x52c   :  { %796 = vpush %v599_v44 }
 0x55d   :  { %s797_s10 = spop %796 }
 0x55e   :  { %s615_s11 = smul.f32 0.125, %s797_s10 }
 0x560   :  { %616 = sst [smem:[#allocation9]] %s615_s11 }
 0x561   :  { %634 = dma.smem_to_hbm %s937_s12, 16, %s1038_s5, [#allocation5]  }
 0x562   :  { %925 = dma.done.wait [#allocation4], 128  }
 0x563   :  { %926 = vsyncadd [#allocation4], 4294967168 }
 0x564   :  { %927 = dma.done.wait [#allocation5], 16  }
 0x565   :  { %928 = vsyncadd [#allocation5], 4294967280 }
 0x566   :  { %641 = sfence }
 0x567   :  { %642 = vsyncpa [#allocation3], 1 }
 0x568   :  { %643 = vsyncpa [#allocation7], 1 }
 0x569   :  { %644 = vsyncpa [#allocation4], 1 }
 0x56a   :  { %645 = vsyncpa [#allocation5], 1 }

</bundles_post_ra>
